<compile_context>
chip_gen: v7x
topology: tpu7x:2x2x1
jax: 0.10.0
libtpu: 0.0.40
codegen_flags: <defaults>
</compile_context>

<pallas_src>
import functools
import math

import jax
import jax.numpy as jnp
from jax.experimental import pallas as pl
from jax.experimental.pallas import tpu as pltpu


def _round_up(x, m):
    return ((x + m - 1) // m) * m


def _cdiv(a, b):
    return -(-a // b)


def _fuse_kernel(x_ref, w1_ref, b1_ref, w2m_ref, b2m_ref, w2p_ref, b2p_ref,
                 out_ref):
    """Fused amp_fuse / pha_fuse + cos/sin recombination on a (2C, TILE) tile.

      x_ref   : (2C, TILE)  rows [0:C) = magnitude, rows [C:2C) = phase
      w1_ref  : (2C, 2C)    block-diag(conv1_amp, conv1_pha)      (C_out, C_in)
      b1_ref  : (2C, 1)
      w2m_ref : (2C, 2C)    [[conv2_amp, 0], [conv2_amp, 0]]  (Mag duplicated)
      b2m_ref : (2C, 1)
      w2p_ref : (2C, 2C)    [[0, conv2_pha], [0, conv2_pha]]  (Pha duplicated)
      b2p_ref : (2C, 1)     rows [C:2C) carry an extra -pi/2 shift
      out_ref : (2C, TILE)  rows [0:C) = Mag*cos(Pha), rows [C:2C) = Mag*sin(Pha)
    """
    x = x_ref[...]

    # Layer 1 of both branches in one MXU push (block-diagonal weight).
    h = jnp.dot(w1_ref[...], x, preferred_element_type=jnp.float32) + b1_ref[...]
    # LeakyReLU(0.1): max(h, 0.1*h) is exact for slope in (0, 1).
    h = jnp.maximum(h, 0.1 * h)

    # Layer 2: duplicated row-blocks put Mag in both sublane halves and Pha
    # (with a -pi/2 bias shift in the lower half) in both halves, so a single
    # lane-dense cos() + multiply produces the full (2C, TILE) real||imag
    # block: cos(Pha - pi/2) == sin(Pha).  Full-sublane unmasked store.
    mag = jnp.dot(w2m_ref[...], h, preferred_element_type=jnp.float32) + b2m_ref[...]
    pha = jnp.dot(w2p_ref[...], h, preferred_element_type=jnp.float32) + b2p_ref[...]
    out_ref[...] = mag * jnp.cos(pha)


def _fuse_pallas(x_cat, packed, tile):
    """x_cat: (N, 2C, HW_pad) magnitude||phase along channels, pixels on lanes.
    Returns (N, 2C, HW_pad): rows [0:C) real, rows [C:2C) imag."""
    N, C2, HW_pad = x_cat.shape
    assert HW_pad % tile == 0
    n_tiles = HW_pad // tile

    w1, b1, w2m, b2m, w2p, b2p = packed

    # Batch dim squeezed out of the kernel view; pixels tiled on lanes.
    x_spec = pl.BlockSpec((None, C2, tile), lambda n, i: (n, 0, i))
    out_spec = pl.BlockSpec((None, C2, tile), lambda n, i: (n, 0, i))
    # Weights / biases are tiny and stay resident across the whole grid.
    w_spec = pl.BlockSpec((C2, C2), lambda n, i: (0, 0))
    b_spec = pl.BlockSpec((C2, 1), lambda n, i: (0, 0))

    return pl.pallas_call(
        _fuse_kernel,
        out_shape=jax.ShapeDtypeStruct((N, C2, HW_pad), jnp.float32),
        grid_spec=pltpu.PrefetchScalarGridSpec(
            num_scalar_prefetch=0,
            grid=(N, n_tiles),
            in_specs=[x_spec, w_spec, b_spec, w_spec, b_spec, w_spec, b_spec],
            out_specs=out_spec,
        ),
        compiler_params=pltpu.CompilerParams(
            # Fully parallel 2-D grid -> sharded across both TensorCores on
            # v7x, no-op on v5e/v6e.
            dimension_semantics=("parallel", "parallel"),
            vmem_limit_bytes=32 << 20),
    )(x_cat, w1, b1, w2m, b2m, w2p, b2p)


def _choose_tile(hw, channels, n_batch, *, vmem_budget=8 << 20, max_tile=32768):
    """Lane-tile from a VMEM budget; bounded padding waste; >=2 grid steps."""
    hw128 = _round_up(hw, 128)
    # f32 input (2C rows) + f32 output (2C rows) per column, double-buffered.
    bytes_per_col = (2 * channels + 2 * channels) * 4 * 2
    tile_cap = min(max_tile, max(128, (vmem_budget // bytes_per_col) // 128 * 128))
    n_tiles = _cdiv(hw128, tile_cap)
    # Guarantee at least 2 parallel grid steps (v7x megacore) when possible.
    if n_batch * n_tiles < 2 and hw128 > 128:
        n_tiles = 2
    # Balance tiles so padding waste stays < n_tiles*128 columns.
    return _round_up(_cdiv(hw128, n_tiles), 128)


@jax.jit
def freup_corner_interp_v2(x, packed_params):
    """Forward pass of freup_Cornerdinterpolation_v2. x is NCHW float32."""
    N, C, H, W = x.shape
    HW = H * W

    # FFT over spatial dims; fftshift over ALL dims (torch default dim=None).
    fft_x = jnp.fft.fftshift(jnp.fft.fft2(x, axes=(-2, -1)))
    mag = jnp.abs(fft_x)
    pha = jnp.angle(fft_x)

    # (N, 2C, H*W): channels on sublanes, pixels on lanes — no transposes.
    # XLA fuses abs/angle/reshape/concat/pad into one producer fusion.
    x_cat = jnp.concatenate(
        [mag.reshape(N, C, HW), pha.reshape(N, C, HW)], axis=1
    ).astype(jnp.float32)

    tile = _choose_tile(HW, C, N)
    HW_pad = _round_up(HW, tile)
    if HW_pad != HW:
        x_cat = jnp.pad(x_cat, ((0, 0), (0, 0), (0, HW_pad - HW)))

    fused = _fuse_pallas(x_cat, packed_params, tile)          # (N, 2C, HW_pad)
    real = fused[:, :C, :HW].reshape(N, C, H, W)
    imag = fused[:, C:, :HW].reshape(N, C, H, W)

    # F.pad(..., (W//2, W//2, H//2, H//2)): padding Mag with zeros makes both
    # real and imag zero in the padded region, so padding the recombined
    # real/imag is exactly equivalent to padding Mag/Pha before cos/sin.
    pad = ((0, 0), (0, 0), (H // 2, H // 2), (W // 2, W // 2))
    out = jax.lax.complex(jnp.pad(real, pad), jnp.pad(imag, pad))

    out = jnp.fft.ifftshift(out)              # ALL dims (torch default dim=None)
    output = jnp.fft.ifft2(out, axes=(-2, -1))
    return jnp.abs(output)


def init_params(key, channels):
    """Synthetic params matching PyTorch Conv2d(C, C, 1) init.
    Returns raw per-branch params in torch layout: weights (C_out, C_in),
    biases (C,)."""
    keys = jax.random.split(key, 8)
    bound = 1.0 / math.sqrt(channels)

    def w(k):
        return jax.random.uniform(k, (channels, channels), jnp.float32,
                                  minval=-bound, maxval=bound)

    def b(k):
        return jax.random.uniform(k, (channels,), jnp.float32,
                                  minval=-bound, maxval=bound)

    return (w(keys[0]), b(keys[1]), w(keys[2]), b(keys[3]),   # amp_fuse
            w(keys[4]), b(keys[5]), w(keys[6]), b(keys[7]))   # pha_fuse


def pack_params(raw):
    """Pack per-branch 1x1-conv params into the fused kernel layout."""
    wa1, ba1, wa2, ba2, wp1, bp1, wp2, bp2 = raw
    C = wa1.shape[0]
    z = jnp.zeros((C, C), jnp.float32)
    w1 = jnp.block([[wa1, z], [z, wp1]])                        # (2C, 2C)
    b1 = jnp.concatenate([ba1, bp1]).reshape(2 * C, 1)          # (2C, 1)
    # Layer 2, duplicated row-blocks so the kernel writes one full (2C, TILE)
    # output: Mag in both halves; Pha in both halves with the lower half's
    # bias pre-shifted by -pi/2 (cos(Pha - pi/2) == sin(Pha)).
    w2m = jnp.block([[wa2, z], [wa2, z]])                       # (2C, 2C)
    b2m = jnp.concatenate([ba2, ba2]).reshape(2 * C, 1)
    w2p = jnp.block([[z, wp2], [z, wp2]])                       # (2C, 2C)
    b2p = jnp.concatenate(
        [bp2, bp2 - jnp.float32(math.pi / 2)]).reshape(2 * C, 1)
    return w1, b1, w2m, b2m, w2p, b2p


@jax.jit
def _reference_forward(x, raw):
    """Pure-JAX reference of the PyTorch module (for correctness check)."""
    wa1, ba1, wa2, ba2, wp1, bp1, wp2, bp2 = raw
    N, C, H, W = x.shape
    fft_x = jnp.fft.fftshift(jnp.fft.fft2(x, axes=(-2, -1)))
    mag = jnp.abs(fft_x)
    pha = jnp.angle(fft_x)

    def conv1x1(v, w, b):
        return jnp.einsum('oc,nchw->nohw', w, v) + b[None, :, None, None]

    def branch(v, w1, b1, w2, b2):
        h = conv1x1(v, w1, b1)
        h = jnp.where(h >= 0, h, 0.1 * h)
        return conv1x1(h, w2, b2)

    Mag = branch(mag, wa1, ba1, wa2, ba2)
    Pha = branch(pha, wp1, bp1, wp2, bp2)
    pad = ((0, 0), (0, 0), (H // 2, H // 2), (W // 2, W // 2))
    Mag = jnp.pad(Mag, pad)
    Pha = jnp.pad(Pha, pad)
    out = jax.lax.complex(Mag * jnp.cos(Pha), Mag * jnp.sin(Pha))
    out = jnp.fft.ifftshift(out)
    return jnp.abs(jnp.fft.ifft2(out, axes=(-2, -1)))


if __name__ == "__main__":
    key = jax.random.PRNGKey(0)
    k_x, k_p = jax.random.split(key)

    N, C, H, W = 2, 4, 16, 16
    x = jax.random.normal(k_x, (N, C, H, W), jnp.float32)
    raw = init_params(k_p, C)
    params = pack_params(raw)

    out = freup_corner_interp_v2(x, params)
    out = jax.block_until_ready(out)

    assert out.shape == (N, C, 2 * H, 2 * W), out.shape
    assert out.dtype == jnp.float32, out.dtype
    assert bool(jnp.all(jnp.isfinite(out)))

    # Numerical check against the pure-JAX reference of the torch module.
    ref = jax.block_until_ready(_reference_forward(x, raw))
    err = float(jnp.max(jnp.abs(out - ref)))
    scale = float(jnp.max(jnp.abs(ref))) + 1e-6
    assert err / scale < 1e-3, (err, scale)

    print("KERNEL_OK")
</pallas_src>

<mosaic_0001>
module attributes {stable_mosaic.version = 11 : i64} {
  func.func @_fuse_kernel(%arg0: i32, %arg1: i32, %arg2: memref<1x8x256xf32, #tpu.memory_space<vmem>>, %arg3: memref<8x8xf32, #tpu.memory_space<vmem>>, %arg4: memref<8x1xf32, #tpu.memory_space<vmem>>, %arg5: memref<8x8xf32, #tpu.memory_space<vmem>>, %arg6: memref<8x1xf32, #tpu.memory_space<vmem>>, %arg7: memref<8x8xf32, #tpu.memory_space<vmem>>, %arg8: memref<8x1xf32, #tpu.memory_space<vmem>>, %arg9: memref<1x8x256xf32, #tpu.memory_space<vmem>>) attributes {dimension_semantics = [#tpu.dimension_semantics<parallel>, #tpu.dimension_semantics<parallel>], iteration_bounds = array<i64: 2, 1>, scalar_prefetch = 0 : i64, scratch_operands = 0 : i64, tpu.core_type = #tpu.core_type<tc>, window_params = [{transform_indices = @transform_0, window_bounds = array<i64: 1, 8, 256>}, {pipeline_mode = #tpu.pipeline_mode<synchronous>, transform_indices = @transform_1, window_bounds = array<i64: 8, 8>}, {pipeline_mode = #tpu.pipeline_mode<synchronous>, transform_indices = @transform_2, window_bounds = array<i64: 8, 1>}, {pipeline_mode = #tpu.pipeline_mode<synchronous>, transform_indices = @transform_3, window_bounds = array<i64: 8, 8>}, {pipeline_mode = #tpu.pipeline_mode<synchronous>, transform_indices = @transform_4, window_bounds = array<i64: 8, 1>}, {pipeline_mode = #tpu.pipeline_mode<synchronous>, transform_indices = @transform_5, window_bounds = array<i64: 8, 8>}, {pipeline_mode = #tpu.pipeline_mode<synchronous>, transform_indices = @transform_6, window_bounds = array<i64: 8, 1>}, {transform_indices = @transform_7, window_bounds = array<i64: 1, 8, 256>}]} {
    %c0 = arith.constant 0 : index
    %c0_0 = arith.constant 0 : index
    %c0_1 = arith.constant 0 : index
    %0 = vector.load %arg2[%c0, %c0_0, %c0_1] : memref<1x8x256xf32, #tpu.memory_space<vmem>>, vector<1x8x256xf32>
    %1 = vector.shape_cast %0 : vector<1x8x256xf32> to vector<8x256xf32>
    %c0_2 = arith.constant 0 : index
    %c0_3 = arith.constant 0 : index
    %2 = vector.load %arg3[%c0_2, %c0_3] : memref<8x8xf32, #tpu.memory_space<vmem>>, vector<8x8xf32>
    %cst = arith.constant dense<0.000000e+00> : vector<8x256xf32>
    %3 = tpu.matmul %2, %1, %cst {dimension_numbers = #tpu.dot_dimension_numbers<[1], [0], [0], [1], [0, 0, 1, 1], [], []>} : vector<8x8xf32>, vector<8x256xf32>, vector<8x256xf32> -> vector<8x256xf32>
    %c0_4 = arith.constant 0 : index
    %c0_5 = arith.constant 0 : index
    %4 = vector.load %arg4[%c0_4, %c0_5] : memref<8x1xf32, #tpu.memory_space<vmem>>, vector<8x1xf32>
    %5 = vector.broadcast %4 : vector<8x1xf32> to vector<8x256xf32>
    %6 = arith.addf %3, %5 : vector<8x256xf32>
    %cst_6 = arith.constant 1.000000e-01 : f32
    %7 = vector.broadcast %cst_6 : f32 to vector<8x256xf32>
    %8 = arith.mulf %7, %6 : vector<8x256xf32>
    %9 = arith.maximumf %6, %8 : vector<8x256xf32>
    %c0_7 = arith.constant 0 : index
    %c0_8 = arith.constant 0 : index
    %10 = vector.load %arg5[%c0_7, %c0_8] : memref<8x8xf32, #tpu.memory_space<vmem>>, vector<8x8xf32>
    %cst_9 = arith.constant dense<0.000000e+00> : vector<8x256xf32>
    %11 = tpu.matmul %10, %9, %cst_9 {dimension_numbers = #tpu.dot_dimension_numbers<[1], [0], [0], [1], [0, 0, 1, 1], [], []>} : vector<8x8xf32>, vector<8x256xf32>, vector<8x256xf32> -> vector<8x256xf32>
    %c0_10 = arith.constant 0 : index
    %c0_11 = arith.constant 0 : index
    %12 = vector.load %arg6[%c0_10, %c0_11] : memref<8x1xf32, #tpu.memory_space<vmem>>, vector<8x1xf32>
    %13 = vector.broadcast %12 : vector<8x1xf32> to vector<8x256xf32>
    %14 = arith.addf %11, %13 : vector<8x256xf32>
    %c0_12 = arith.constant 0 : index
    %c0_13 = arith.constant 0 : index
    %15 = vector.load %arg7[%c0_12, %c0_13] : memref<8x8xf32, #tpu.memory_space<vmem>>, vector<8x8xf32>
    %cst_14 = arith.constant dense<0.000000e+00> : vector<8x256xf32>
    %16 = tpu.matmul %15, %9, %cst_14 {dimension_numbers = #tpu.dot_dimension_numbers<[1], [0], [0], [1], [0, 0, 1, 1], [], []>} : vector<8x8xf32>, vector<8x256xf32>, vector<8x256xf32> -> vector<8x256xf32>
    %c0_15 = arith.constant 0 : index
    %c0_16 = arith.constant 0 : index
    %17 = vector.load %arg8[%c0_15, %c0_16] : memref<8x1xf32, #tpu.memory_space<vmem>>, vector<8x1xf32>
    %18 = vector.broadcast %17 : vector<8x1xf32> to vector<8x256xf32>
    %19 = arith.addf %16, %18 : vector<8x256xf32>
    %20 = math.cos %19 : vector<8x256xf32>
    %21 = arith.mulf %14, %20 : vector<8x256xf32>
    %c0_17 = arith.constant 0 : index
    %c0_18 = arith.constant 0 : index
    %c0_19 = arith.constant 0 : index
    %22 = vector.load %arg9[%c0_17, %c0_18, %c0_19] : memref<1x8x256xf32, #tpu.memory_space<vmem>>, vector<1x8x256xf32>
    %23 = vector.shape_cast %22 : vector<1x8x256xf32> to vector<8x256xf32>
    %24 = vector.shape_cast %21 : vector<8x256xf32> to vector<1x8x256xf32>
    tpu.vector_store %arg9[%c0_17, %c0_18, %c0_19], %24 {strides = array<i32>} : memref<1x8x256xf32, #tpu.memory_space<vmem>>, vector<1x8x256xf32>,
    return
  }
  func.func @transform_0(%arg0: i32, %arg1: i32) -> (i32, i32, i32) {
    %c0_i32 = arith.constant 0 : i32
    %c0_i32_0 = arith.constant 0 : i32
    return %arg0, %c0_i32, %arg1 : i32, i32, i32
  }
  func.func @transform_1(%arg0: i32, %arg1: i32) -> (i32, i32) {
    %c0_i32 = arith.constant 0 : i32
    %c0_i32_0 = arith.constant 0 : i32
    %c0_i32_1 = arith.constant 0 : i32
    return %c0_i32, %c0_i32_0 : i32, i32
  }
  func.func @transform_2(%arg0: i32, %arg1: i32) -> (i32, i32) {
    %c0_i32 = arith.constant 0 : i32
    %c0_i32_0 = arith.constant 0 : i32
    %c0_i32_1 = arith.constant 0 : i32
    return %c0_i32, %c0_i32_0 : i32, i32
  }
  func.func @transform_3(%arg0: i32, %arg1: i32) -> (i32, i32) {
    %c0_i32 = arith.constant 0 : i32
    %c0_i32_0 = arith.constant 0 : i32
    %c0_i32_1 = arith.constant 0 : i32
    return %c0_i32, %c0_i32_0 : i32, i32
  }
  func.func @transform_4(%arg0: i32, %arg1: i32) -> (i32, i32) {
    %c0_i32 = arith.constant 0 : i32
    %c0_i32_0 = arith.constant 0 : i32
    %c0_i32_1 = arith.constant 0 : i32
    return %c0_i32, %c0_i32_0 : i32, i32
  }
  func.func @transform_5(%arg0: i32, %arg1: i32) -> (i32, i32) {
    %c0_i32 = arith.constant 0 : i32
    %c0_i32_0 = arith.constant 0 : i32
    %c0_i32_1 = arith.constant 0 : i32
    return %c0_i32, %c0_i32_0 : i32, i32
  }
  func.func @transform_6(%arg0: i32, %arg1: i32) -> (i32, i32) {
    %c0_i32 = arith.constant 0 : i32
    %c0_i32_0 = arith.constant 0 : i32
    %c0_i32_1 = arith.constant 0 : i32
    return %c0_i32, %c0_i32_0 : i32, i32
  }
  func.func @transform_7(%arg0: i32, %arg1: i32) -> (i32, i32, i32) {
    %c0_i32 = arith.constant 0 : i32
    %c0_i32_0 = arith.constant 0 : i32
    return %arg0, %c0_i32, %arg1 : i32, i32, i32
  }
}

</mosaic_0001>

<bundles_post_ra>
// kernel: freup_corner_interp_v2.1
= control target key start
LH: loop header
LB: loop body
LE: loop exit
PB: predicated region body
PF: predicated region fallthrough
CT: control target
= control target key end

     0   :  { %s1011_s24 = smov 0   ;;  %s1013_s25 = smov 0   ;;  %s1156_s0 = inlined_call_operand.vmem [shape: f32[2,8,256], index: 0, kind: input, shape index: {}]   ;;  %s1157_s1 = inlined_call_operand.vmem [shape: f32[8,8], index: 1, kind: input, shape index: {}]   ;;  %s1158_s2 = inlined_call_operand.vmem [shape: f32[8,1], index: 2, kind: input, shape index: {}]   ;;  %s1159_s3 = inlined_call_operand.vmem [shape: f32[8,8], index: 3, kind: input, shape index: {}]   ;;  %s1160_s4 = inlined_call_operand.vmem [shape: f32[8,1], index: 4, kind: input, shape index: {}]   ;;  %s1161_s5 = inlined_call_operand.vmem [shape: f32[8,8], index: 5, kind: input, shape index: {}]   ;;  %s1162_s6 = inlined_call_operand.vmem [shape: f32[8,1], index: 6, kind: input, shape index: {}]   ;;  %s1163_s7 = inlined_call_operand.vmem [shape: f32[2,8,256], index: 7, kind: output, shape index: {}]  }
   0x1   :  { %s1015_s26 = smov 0  }
   0x2 LB: > { %s29_s27 = sadd.s32 1, %s957_s25  ;;  %p869_p0 = scmp.ge.s32.totalorder %s961_s26, 1  ;;  %s961_s26 = sphi %s1015_s26, %s17_s26   ;;  %s957_s25 = sphi %s1013_s25, %s1169_s25   ;;  %s953_s24 = sphi %s1011_s24, %s1168_s24  }
   0x3   : > { %p31_p1 = scmp.ge.s32.totalorder %s29_s27, 2  ;;  %p258_p2 = scmp.lt.s32.totalorder %s961_s26, 3 }
   0x5   : > { %s1171_s27 = smov (%p31_p1, %s29_s27), 0  ;;  %p259_p3 = pnand %p869_p0, %p258_p2 }
   0x6   : > { %p299_p4 = scmp.lt.s32.totalorder (!%p259_p3), %s953_s24, 1  ;;  %v321_v0 = vld [vmem:[%s1158_s2] sm:$0xff] (!%p259_p3)  ;;  %v963_v1 = vmov (!%p259_p3), 0.0   ;;  %v964_v2 = vmov (!%p259_p3), 0   ;;  %vm327_vm0 = vcmask (!%p259_p3), 64512  }
   0x7   : > { %262 = sbr.rel (%p259_p3) target bundleno = 547 (0x223), region = 48  ;;  %395 = vmatprep.mubr.f32.mxu0 (!%p259_p3), %v963_v1  ;;  %929 = vset.pattern.permute.xlu0 (!%p259_p3), %v964_v2  ;;  %v488_v3 = vld [vmem:[%s1162_s6] sm:$0xff] (!%p259_p3)  ;;  %v965_v46 = vmov (!%p259_p3), 683565275   ;;  %v966_v50 = vmov (!%p259_p3), 2475754826  }
   0x8   : > { %324 = vperm.xlu0 (!%p259_p3), %929, %v321_v0   ;;  %480 = vmatprep.mubr.f32.mxu1 (!%p259_p3), %v963_v1  ;;  %v320_v6 = vld [vmem:[%s1157_s1] sm:$0xff] (!%p259_p3)  ;;  %v967_v52 = vmov (!%p259_p3), 2131351028   ;;  %v968_v54 = vmov (!%p259_p3), 2102212464  }
   0x9   : > { %930 = vset.pattern.permute.xlu1 (!%p259_p3), %v964_v2  ;;  %v407_v7 = vld [vmem:[%s1160_s4] sm:$0xff] (!%p259_p3)  ;;  %v969_v56 = vmov (!%p259_p3), 920167782   ;;  %v970_v63 = vmov (!%p259_p3), 1326507024  }
   0xa   : > { %410 = vperm.xlu1 (!%p259_p3), %930, %v407_v7   ;;  %v487_v17 = vld [vmem:[%s1161_s5] sm:$0xff] (!%p259_p3) }
   0xb   : > { %v406_v18 = vld [vmem:[%s1159_s3] sm:$0xff] (!%p259_p3) }
   0xc   : > { %491 = vperm.xlu0 (!%p259_p3), %929, %v488_v3  }
   0xe   : > { %s1173_s24 = smov (!%p299_p4, %s953_s24), 1 }
   0xf   : > { %s887_s9 = sshll.u32 %s1173_s24, 4 }
  0x10   : > { %s306_s12 = scalar_lea.vmem %s1156_s0, %s887_s9  ;;  %s316_s23 = scalar_lea.vmem %s1163_s7, %s887_s9 }
  0x11   : > { %v319_v4 = vld [vmem:[%s306_s12 + $0x8] sm:$0xff]  ;;  %v318_v5 = vld [vmem:[%s306_s12] sm:$0xff] }
  0x12   : > { %331 = vmatprep.subr.mxu0 %v319_v4 }
  0x13   : > { %332 = vmatpush1.msra.mxu0 %v318_v5 }
  0x14   : > { %874 = vmatmul.mubr.msk.f32.vlgmr.msra.gmra.mrb[0].mxu0 %vm327_vm0, %v320_v6 }
  0x15   : > { %561 = vmatprep.mubr.f32.mxu0 %v963_v1 }
  0x87   : > { %v325_v8 = vpop.permute.xlu0 %324 }
  0x8b   : > { %v492_v19 = vpop.permute.xlu0 %491 }
  0xe7   : > { %v397_v9 = vpop.f32.mrb[0].mxu0 }
  0xe8   : > { %v398_v10 = vadd.f32 %v397_v9, %v325_v8  ;;  %v399_v11 = vpop.f32.mrb[1].mxu0 }
  0xe9   : > { %v400_v12 = vadd.f32 %v399_v11, %v325_v8 }
  0xea   : > { %v402_v13 = vmul.f32 0.1, %v398_v10 }
  0xeb   : > { %v403_v14 = vmul.f32 0.1, %v400_v12 }
  0xec   : > { %v404_v16 = vmax.f32 %v398_v10, %v402_v13 }
  0xed   : > { %v405_v15 = vmax.f32 %v400_v12, %v403_v14 }
  0xef   : > { %416 = vmatprep.subr.mxu1 %v405_v15  ;;  %497 = vmatprep.subr.mxu0 %v405_v15 }
  0xf0   : > { %417 = vmatpush1.msra.mxu1 %v404_v16  ;;  %498 = vmatpush1.msra.mxu0 %v404_v16 }
  0xf1   : > { %876 = vmatmul.mubr.msk.f32.vlgmr.msra.gmra.mrb[2].mxu0 %vm327_vm0, %v487_v17  ;;  %875 = vmatmul.mubr.msk.f32.vlgmr.msra.gmra.mrb[0].mxu1 %vm327_vm0, %v406_v18 }
 0x1c4   : > { %v563_v20 = vpop.f32.mrb[2].mxu0  ;;  %v1058_v21 = vpop.f32.mrb[0].mxu1 }
 0x1c5   : > { %v1060_v22 = vadd.f32 %v563_v20, %v492_v19  ;;  %v565_v23 = vpop.f32.mrb[3].mxu0  ;;  %v1062_v24 = vpop.f32.mrb[1].mxu1 }
 0x1c6   : > { %v1064_v25 = vadd.f32 %v565_v23, %v492_v19 }
 0x1c7   : > { %v568_v26 = vand.u32 2147483647, %v1060_v22  ;;  %v571_v27 = vand.u32 2139095040, %v1060_v22  ;;  %vm570_vm15 = vcmp.lt.s32.totalorder %v1060_v22, 0 }
 0x1c8   : > { %v674_v28 = vand.u32 2139095040, %v1064_v25  ;;  %v671_v31 = vand.u32 2147483647, %v1064_v25 }
 0x1c9   : > { %v572_v29 = vshrl.u32 %v571_v27, 23  ;;  %v575_v30 = vand.u32 8388607, %v568_v26  ;;  %vm1117_vm0 = vcmp.le.f32.partialorder %v568_v26, 0.7853982 }
 0x1ca   : > { %v675_v32 = vshrl.u32 %v674_v28, 23  ;;  %v1074_v37 = vand.u32 8388607, %v671_v31 }
 0x1cb   : > { %v877_v33 = vadd.s32 4294967169, %v572_v29  ;;  %v576_v36 = vor.u32 8388608, %v575_v30 }
 0x1cc   : > { %v881_v34 = vadd.s32 4294967169, %v675_v32  ;;  %v679_v44 = vor.u32 8388608, %v1074_v37 }
 0x1cd   : > { %v578_v35 = vadd.s32 1, %v877_v33  ;;  %v1076_v43 = vshll.u32 %v576_v36, 8 }
 0x1ce   : > { %v681_v38 = vadd.s32 1, %v881_v34 }
 0x1cf   : > { %vm579_vm1 = vcmp.gt.s32.totalorder %v578_v35, 0 }
 0x1d0   : > { %v580_v39 = vsel %vm579_vm1, %v578_v35, 0  ;;  %vm682_vm2 = vcmp.gt.s32.totalorder %v681_v38, 0  ;;  %vm673_vm1 = vcmp.lt.s32.totalorder %v1064_v25, 0 }
 0x1d1   : > { %v581_v40 = vshrl.u32 %v580_v39, 5  ;;  %v582_v41 = vand.u32 31, %v580_v39  ;;  %v683_v42 = vsel %vm682_vm2, %v681_v38, 0  ;;  %vm1129_vm2 = vcmp.le.f32.partialorder %v671_v31, 0.7853982 }
 0x1d2   : > { %v1079_v48 = vshrl.u32 %v683_v42, 5  ;;  %v685_v49 = vand.u32 31, %v683_v42 }
 0x1d3   : > { %v583_v45 = vsub.s32 32, %v582_v41  ;;  %v585_v47 = vshll.u32 %v965_v46, %v582_v41  ;;  %v588_v51 = vshll.u32 %v966_v50, %v582_v41  ;;  %v591_v53 = vshll.u32 %v967_v52, %v582_v41 }
 0x1d4   : > { %v594_v55 = vshll.u32 %v968_v54, %v582_v41  ;;  %v597_v57 = vshll.u32 %v969_v56, %v582_v41  ;;  %vm600_vm3 = vcmp.lt.s32.totalorder %v581_v40, 1  ;;  %vm601_vm4 = vcmp.lt.s32.totalorder %v581_v40, 2 }
 0x1d5   : > { %v586_v58 = vshrl.u32 %v966_v50, %v583_v45  ;;  %v589_v59 = vshrl.u32 %v967_v52, %v583_v45  ;;  %v592_v60 = vshrl.u32 %v968_v54, %v583_v45  ;;  %v584_v61 = vshrl.u32 %v965_v46, %v583_v45 }
 0x1d6   : > { %v595_v62 = vshrl.u32 %v969_v56, %v583_v45  ;;  %v598_v0 = vshrl.u32 %v970_v63, %v583_v45  ;;  %v686_v4 = vsub.s32 32, %v685_v49  ;;  %vm602_vm5 = vcmp.lt.s32.totalorder %v581_v40, 3 }
 0x1d7   : > { %v587_v1 = vor.u32 %v586_v58, %v585_v47  ;;  %v590_v2 = vor.u32 %v589_v59, %v588_v51  ;;  %v593_v3 = vor.u32 %v592_v60, %v591_v53  ;;  %vm603_vm6 = vcmp.lt.s32.totalorder %v581_v40, 4 }
 0x1d8   : > { %v596_v5 = vor.u32 %v595_v62, %v594_v55  ;;  %v599_v6 = vor.u32 %v598_v0, %v597_v57  ;;  %v688_v14 = vshll.u32 %v965_v46, %v685_v49  ;;  %v689_v17 = vshrl.u32 %v966_v50, %v686_v4 }
 0x1d9   : > { %v604_v7 = vsel %vm600_vm3, %v584_v61, %v587_v1  ;;  %v605_v8 = vsel %vm603_vm6, %v593_v3, 2102212464  ;;  %v608_v9 = vsel %vm600_vm3, %v587_v1, %v590_v2  ;;  %v612_v10 = vsel %vm600_vm3, %v590_v2, %v593_v3 }
 0x1da   : > { %v606_v11 = vsel %vm602_vm5, %v590_v2, %v605_v8  ;;  %v609_v12 = vsel %vm603_vm6, %v596_v5, 920167782  ;;  %v613_v13 = vsel %vm603_vm6, %v599_v6, 1326507024  ;;  %v691_v18 = vshll.u32 %v966_v50, %v685_v49 }
 0x1db   : > { %v610_v15 = vsel %vm602_vm5, %v593_v3, %v609_v12  ;;  %v614_v16 = vsel %vm602_vm5, %v596_v5, %v613_v13  ;;  %v607_v19 = vsel %vm601_vm4, %v604_v7, %v606_v11  ;;  %v692_v27 = vshrl.u32 %v967_v52, %v686_v4 }
 0x1dc   : > { %v611_v20 = vsel %vm601_vm4, %v608_v9, %v610_v15  ;;  %v615_v23 = vsel %vm601_vm4, %v612_v10, %v614_v16  ;;  %v690_v33 = vor.u32 %v689_v17, %v688_v14  ;;  %v694_v35 = vshll.u32 %v967_v52, %v685_v49 }
 0x1dd   : > { %v1088_v28 = vmul.u32.u64.low %v1076_v43, %v615_v23  ;;  %v1089_v29 = vmul.u32.u64.high %v1076_v43, %v615_v23, %v1088_v28  ;;  %v1092_v30 = vmul.u32.u64.low %v1076_v43, %v611_v20  ;;  %v1093_v32 = vmul.u32.u64.high %v1076_v43, %v611_v20, %v1092_v30 }
 0x1de   : > { %v693_v34 = vor.u32 %v692_v27, %v691_v18  ;;  %v695_v36 = vshrl.u32 %v968_v54, %v686_v4  ;;  %v697_v37 = vshll.u32 %v968_v54, %v685_v49  ;;  %v698_v38 = vshrl.u32 %v969_v56, %v686_v4 }
 0x1df   : > { %v701_v39 = vshrl.u32 %v970_v63, %v686_v4  ;;  %v719_v41 = vshll.u32 %v679_v44, 8  ;;  %v623_v40 = vmul.u32 %v1076_v43, %v607_v19  ;;  %v687_v42 = vshrl.u32 %v965_v46, %v686_v4 }
 0x1e0   : > { %v696_v45 = vor.u32 %v695_v36, %v694_v35  ;;  %v700_v47 = vshll.u32 %v969_v56, %v685_v49  ;;  %vm625_vm7 = vc.u32 %v1089_v29, %v1092_v30  ;;  %v626_v50 = vadd.s32 1, %v1093_v32 }
 0x1e1   : > { %v699_v51 = vor.u32 %v698_v38, %v697_v37  ;;  %vm703_vm8 = vcmp.lt.s32.totalorder %v1079_v48, 1  ;;  %vm705_vm9 = vcmp.lt.s32.totalorder %v1079_v48, 3  ;;  %vm706_vm10 = vcmp.lt.s32.totalorder %v1079_v48, 4 }
 0x1e2   : > { %v702_v53 = vor.u32 %v701_v39, %v700_v47  ;;  %v711_v52 = vsel %vm703_vm8, %v690_v33, %v693_v34  ;;  %v627_v44 = vsel %vm625_vm7, %v626_v50, %v1093_v32  ;;  %v708_v54 = vsel %vm706_vm10, %v696_v45, 2102212464 }
 0x1e3   : > { %v712_v43 = vsel %vm706_vm10, %v699_v51, 920167782  ;;  %v715_v46 = vsel %vm703_vm8, %v693_v34, %v696_v45  ;;  %v628_v55 = vadd.s32 %v627_v44, %v623_v40  ;;  %vm704_vm11 = vcmp.lt.s32.totalorder %v1079_v48, 2 }
 0x1e4   : > { %v713_v49 = vsel %vm705_vm9, %v696_v45, %v712_v43  ;;  %v716_v56 = vsel %vm706_vm10, %v702_v53, 1326507024  ;;  %v707_v57 = vsel %vm703_vm8, %v687_v42, %v690_v33  ;;  %v709_v58 = vsel %vm705_vm9, %v693_v34, %v708_v54 }
 0x1e5   : > { %v714_v59 = vsel %vm704_vm11, %v711_v52, %v713_v49  ;;  %v717_v60 = vsel %vm705_vm9, %v699_v51, %v716_v56  ;;  %v629_v61 = vadd.s32 536870912, %v628_v55  ;;  %v710_v4 = vsel %vm704_vm11, %v707_v57, %v709_v58 }
 0x1e6   : > { %v718_v62 = vsel %vm704_vm11, %v715_v46, %v717_v60  ;;  %v1103_v63 = vmul.u32.u64.low %v719_v41, %v714_v59  ;;  %v1104_v0 = vmul.u32.u64.high %v719_v41, %v714_v59, %v1103_v63  ;;  %v726_v48 = vmul.u32 %v719_v41, %v710_v4  ;;  %v411_v4 = vpop.permute.xlu1 %410 }
 0x1e7   : > { %v1106_v1 = vmul.u32.u64.low %v719_v41, %v718_v62  ;;  %v1107_v2 = vmul.u32.u64.high %v719_v41, %v718_v62, %v1106_v1  ;;  %v630_v3 = vshrl.u32 %v629_v61, 30  ;;  %v624_v20 = vadd.s32 %v1092_v30, %v1089_v29 }
 0x1e8   : > { %v729_v6 = vadd.s32 1, %v1104_v0  ;;  %v483_v31 = vadd.f32 %v1058_v21, %v411_v4  ;;  %vm660_vm6 = vweird.f32 %v1060_v22  ;;  %vm763_vm10 = vweird.f32 %v1064_v25 }
 0x1e9   : > { %v631_v5 = vshll.u32 %v630_v3, 30  ;;  %vm728_vm12 = vc.u32 %v1107_v2, %v1103_v63  ;;  %v727_v45 = vadd.s32 %v1103_v63, %v1107_v2 }
 0x1ea   : > { %v730_v8 = vsel %vm728_vm12, %v729_v6, %v1104_v0 }
 0x1eb   : > { %v632_v7 = vsub.s32 %v628_v55, %v631_v5  ;;  %v731_v9 = vadd.s32 %v730_v8, %v726_v48  ;;  %v654_v55 = vsub.s32 4, %v630_v3 }
 0x1ed   : > { %v634_v10 = vsub.s32 0, %v632_v7  ;;  %v732_v11 = vadd.s32 536870912, %v731_v9  ;;  %v655_v59 = vsel %vm570_vm15, %v654_v55, %v630_v3 }
 0x1ee   : > { %v657_v62 = vsel %vm1117_vm0, 0, %v655_v59 }
 0x1ef   : > { %v878_v12 = vmin.u32 %v634_v10, %v632_v7  ;;  %v733_v13 = vshrl.u32 %v732_v11, 30  ;;  %v661_v1 = vand.u32 3, %v657_v62 }
 0x1f1   : > { %v636_v14 = vclz %v878_v12  ;;  %v734_v15 = vshll.u32 %v733_v13, 30  ;;  %v757_v0 = vsub.s32 4, %v733_v13  ;;  %vm666_vm3 = vcmp.eq.s32.totalorder %v661_v1, 2 }
 0x1f2   : > { %vm663_vm4 = vcmp.eq.s32.totalorder %v661_v1, 0  ;;  %vm662_vm5 = vcmp.lt.s32.totalorder %v661_v1, 2 }
 0x1f3   : > { %v879_v16 = vadd.s32 4294967294, %v636_v14  ;;  %v735_v17 = vsub.s32 %v731_v9, %v734_v15  ;;  %v758_v48 = vsel %vm673_vm1, %v757_v0, %v733_v13 }
 0x1f4   : > { %v760_v10 = vsel %vm1129_vm2, 0, %v758_v48 }
 0x1f5   : > { %vm880_vm13 = vcmp.lt.s32.totalorder %v879_v16, 0  ;;  %v737_v19 = vsub.s32 0, %v735_v17  ;;  %v764_v14 = vand.u32 3, %v760_v10 }
 0x1f6   : > { %v639_v18 = vsel %vm880_vm13, 0, %v879_v16 }
 0x1f7   : > { %v640_v23 = vsub.s32 32, %v639_v18  ;;  %v644_v27 = vsub.s32 4294967266, %v639_v18  ;;  %v882_v28 = vmin.u32 %v737_v19, %v735_v17  ;;  %v641_v32 = vshll.u32 %v632_v7, %v639_v18 }
 0x1f8   : > { %vm769_vm7 = vcmp.eq.s32.totalorder %v764_v14, 2  ;;  %v485_v18 = vadd.f32 %v1062_v24, %v411_v4  ;;  %vm766_vm8 = vcmp.eq.s32.totalorder %v764_v14, 0  ;;  %vm765_vm9 = vcmp.lt.s32.totalorder %v764_v14, 2 }
 0x1f9   : > { %v642_v33 = vshrl.u32 %v624_v20, %v640_v23  ;;  %v645_v34 = vadd.s32 127, %v644_v27  ;;  %v739_v35 = vclz %v882_v28 }
 0x1fb   : > { %v643_v36 = vor.u32 %v642_v33, %v641_v32  ;;  %v646_v37 = vshll.u32 %v645_v34, 23  ;;  %v883_v38 = vadd.s32 4294967294, %v739_v35 }
 0x1fd   : > { %v647_v39 = vor.u32 4788187, %v646_v37  ;;  %vm884_vm14 = vcmp.lt.s32.totalorder %v883_v38, 0  ;;  %v650_v40 = vcvt.s32.f32 %v643_v36 }
 0x1fe   : > { %v742_v42 = vsel %vm884_vm14, 0, %v883_v38 }
 0x1ff   : > { %v648_v41 = vand.u32 2147483647, %v647_v39  ;;  %v743_v47 = vsub.s32 32, %v742_v42  ;;  %v747_v50 = vsub.s32 4294967266, %v742_v42  ;;  %v744_v30 = vshll.u32 %v735_v17, %v742_v42 }
 0x201   : > { %v651_v29 = vmul.f32 %v650_v40, %v648_v41  ;;  %v745_v51 = vshrl.u32 %v727_v45, %v743_v47  ;;  %v748_v53 = vadd.s32 127, %v747_v50 }
 0x203   : > { %v652_v52 = vxor.u32 2147483648, %v651_v29  ;;  %v746_v44 = vor.u32 %v745_v51, %v744_v30  ;;  %v749_v54 = vshll.u32 %v748_v53, 23 }
 0x205   : > { %v653_v43 = vsel %vm570_vm15, %v652_v52, %v651_v29  ;;  %v750_v49 = vor.u32 4788187, %v749_v54  ;;  %v753_v58 = vcvt.s32.f32 %v746_v44 }
 0x206   : > { %v656_v56 = vsel %vm1117_vm0, %v1060_v22, %v653_v43 }
 0x207   : > { %931 = vcosq.f32 %v656_v56  ;;  %v751_v57 = vand.u32 2147483647, %v750_v49 }
 0x208   : > { %933 = vsinq.f32 %v656_v56 }
 0x209   : > { %v754_v60 = vmul.f32 %v753_v58, %v751_v57 }
 0x20b   : > { %v755_v61 = vxor.u32 2147483648, %v754_v60 }
 0x20d   : > { %v756_v26 = vsel %vm673_vm1, %v755_v61, %v754_v60 }
 0x20e   : > { %v759_v2 = vsel %vm1129_vm2, %v1064_v25, %v756_v26 }
 0x20f   : > { %935 = vcosq.f32 %v759_v2 }
 0x210   : > { %937 = vsinq.f32 %v759_v2 }
 0x211   : > { %v932_v3 = vpop.eup %931 }
 0x212   : > { %v934_v5 = vpop.eup %933  ;;  %v667_v6 = vxor.u32 2147483648, %v932_v3 }
 0x213   : > { %v664_v7 = vxor.u32 2147483648, %v934_v5 }
 0x214   : > { %v668_v8 = vsel %vm666_vm3, %v667_v6, %v934_v5 }
 0x215   : > { %v665_v9 = vsel %vm663_vm4, %v932_v3, %v664_v7 }
 0x216   : > { %v669_v11 = vsel %vm662_vm5, %v665_v9, %v668_v8 }
 0x217   : > { %v670_v12 = vsel %vm660_vm6, nan, %v669_v11 }
 0x218   : > { %v774_v13 = vmul.f32 %v670_v12, %v483_v31 }
 0x219   : > { %v936_v15 = vpop.eup %935 }
 0x21a   : > { %776 = vst [vmem:[%s316_s23] sm:$0xff] %v774_v13  ;;  %v938_v21 = vpop.eup %937  ;;  %v770_v16 = vxor.u32 2147483648, %v936_v15 }
 0x21b   : > { %v767_v17 = vxor.u32 2147483648, %v938_v21 }
 0x21c   : > { %v771_v19 = vsel %vm769_vm7, %v770_v16, %v938_v21 }
 0x21d   : > { %v768_v22 = vsel %vm766_vm8, %v936_v15, %v767_v17 }
 0x21e   : > { %v772_v20 = vsel %vm765_vm9, %v768_v22, %v771_v19 }
 0x21f   : > { %v773_v23 = vsel %vm763_vm10, nan, %v772_v20 }
 0x220   : > { %v775_v27 = vmul.f32 %v773_v23, %v485_v18 }
 0x222   : > { %777 = vst [vmem:[%s316_s23 + $0x8] sm:$0xff] %v775_v27 }
 0x223 PF: > { %s17_s26 = sadd.s32 1, %s961_s26   ;;  %s1168_s24 = smov %s957_s25 }
 0x224   : > { %p14_p5 = scmp.ge.s32.totalorder %s17_s26, 4   ;;  %s1169_s25 = smov %s1171_s27 }
 0x226   :  { %16 = sbr.rel (!%p14_p5) target bundleno = 2 (0x2), region = 78 }

</bundles_post_ra>
